<compile_context>
chip_gen: v6e
topology: v6e:2x2x1
jax: 0.10.0
libtpu: 0.0.40
codegen_flags: <defaults>
</compile_context>

<pallas_src>
import jax
import jax.numpy as jnp
from jax.experimental import pallas as pl
from jax.experimental.pallas import tpu as pltpu


def _round_up(n: int, m: int) -> int:
    return ((n + m - 1) // m) * m


# --------------------------------------------------------------------------
# Kernel body
# --------------------------------------------------------------------------
def _make_cross_kernel(num_layers: int, matmul_dtype):
    """One (TM, Dp) batch tile through all cross layers; weights VMEM-resident."""

    def cross_kernel(x_ref, w_ref, b_ref, o_ref):
        x0 = x_ref[...].astype(jnp.float32)            # (TM, Dp) f32

        def layer(i, x):
            # Weights are pre-transposed in prepare_cross_params -> plain x @ w.
            lhs = x if matmul_dtype is None else x.astype(matmul_dtype)
            xw = jnp.dot(lhs, w_ref[i],                 # MXU, f32 accumulate
                         preferred_element_type=jnp.float32)
            # b_ref[i] is a (1, Dp) f32 row -> sublane-broadcast add on the VPU.
            return x0 * xw + b_ref[i] + x

        x = x0
        if num_layers <= 8:
            # Small static L: fully unrolled; one MXU matmul + fused VPU update
            # per layer, scheduled across layers by the LLO.
            for i in range(num_layers):
                x = layer(i, x)
        else:
            # Deep L: partial unroll keeps only ~one layer's (x0, x, xw) f32
            # live set resident instead of L of them (avoids vreg/VMEM spill).
            x = jax.lax.fori_loop(0, num_layers, layer, x, unroll=2)

        o_ref[...] = x.astype(o_ref.dtype)

    return cross_kernel


# --------------------------------------------------------------------------
# Tiling / VMEM heuristics
# --------------------------------------------------------------------------
def _pick_tm(batch: int) -> int:
    """Batch-tile rows.

    * batch <= 256: one tile (splitting would drop below the 256-row floor
      that keeps the v6e/v7x 2x256^2 MXU M-dim full).
    * batch  > 256: >= 2 tiles so the "parallel" batch axis shards across both
      v7x TensorCores; each tile 256..512 rows.
    """
    if batch <= 256:
        return _round_up(max(batch, 8), 8)
    return min(_round_up(pl.cdiv(batch, 2), 256), 512)


def _vmem_capacity_bytes() -> int:
    # Generation-aware capacity; conservative (v7x-sized) fallback when the
    # query is unavailable (capability probe only).
    try:
        return int(pltpu.get_tpu_info().vmem_capacity_bytes)
    except Exception:
        return 64 << 20


def _vmem_need_bytes(tm, dp, num_layers, w_itemsize, x_itemsize):
    tile = tm * dp
    io_tiles = 2 * 2 * tile * x_itemsize              # x + out, double-buffered
    weights = num_layers * dp * dp * w_itemsize
    biases = num_layers * dp * 4
    f32_live = 3 * tile * 4                           # x0, x, xw intermediates
    # Grid-invariant weights/biases still get the default 2x buffer allocation
    # (only one DMA actually happens since the block index never changes).
    return io_tiles + 2 * (weights + biases) + f32_live


# --------------------------------------------------------------------------
# Parameter preparation (one-time; hoisted out of the forward)
# --------------------------------------------------------------------------
def prepare_cross_params(weights, biases, matmul_dtype=jnp.bfloat16):
    """Transpose (in-dim last), cast, and lane-pad the parameters once.

    weights: (L, D, D) in nn.Linear layout (layer i computes x @ weights[i].T)
    biases:  (L, D)
    Returns (w_t: (L, Dp, Dp) matmul dtype, b_r: (L, 1, Dp) f32),
    Dp = round_up(D, 128).
    """
    L, D, D2 = weights.shape
    assert D == D2 and biases.shape == (L, D)
    dp = _round_up(max(D, 128), 128)
    w_t = jnp.swapaxes(weights, -1, -2)
    if matmul_dtype is not None:
        w_t = w_t.astype(matmul_dtype)
    b = biases.astype(jnp.float32)
    if dp != D:
        w_t = jnp.pad(w_t, ((0, 0), (0, dp - D), (0, dp - D)))
        b = jnp.pad(b, ((0, 0), (0, dp - D)))
    return w_t, b.reshape(L, 1, dp)


# --------------------------------------------------------------------------
# Forward
# --------------------------------------------------------------------------
def cross_network(x, w_t, b_r, *, block_batch=None, donate_x=False):
    """CrossNetwork forward.  x: (B, D); (w_t, b_r) from prepare_cross_params."""
    B, D = x.shape
    L, dp, dp2 = w_t.shape
    assert dp == dp2 and dp % 128 == 0 and dp >= D
    assert b_r.shape == (L, 1, dp)

    # Exact f32 path when the prepared weights are f32; else mixed precision.
    matmul_dtype = None if w_t.dtype == jnp.float32 else w_t.dtype

    tm = _pick_tm(B) if block_batch is None else _round_up(block_batch, 8)
    w_item = jnp.dtype(w_t.dtype).itemsize
    x_item = jnp.dtype(x.dtype).itemsize

    cap = int(0.85 * _vmem_capacity_bytes())           # leave compiler headroom
    while tm > 8 and _vmem_need_bytes(tm, dp, L, w_item, x_item) > cap:
        tm = max(8, _round_up(tm // 2, 8))
    need = _vmem_need_bytes(tm, dp, L, w_item, x_item)
    vmem_limit = int(min(cap, max(2 * need, 32 << 20)))

    num_tiles = pl.cdiv(B, tm)
    bp = num_tiles * tm
    xp = x
    if bp != B or dp != D:
        # Zero-pad: padded lanes/rows stay well-defined (no garbage rows in the
        # last tile) and padded feature lanes remain exactly zero per layer.
        xp = jnp.pad(x, ((0, bp - B), (0, dp - D)))

    kernel = _make_cross_kernel(L, matmul_dtype)

    flops = 2 * bp * dp * dp * L + 4 * bp * dp * L
    bytes_accessed = 2 * bp * dp * x_item + L * dp * dp * w_item + L * dp * 4

    out = pl.pallas_call(
        kernel,
        out_shape=jax.ShapeDtypeStruct((bp, dp), x.dtype),
        grid_spec=pltpu.PrefetchScalarGridSpec(
            num_scalar_prefetch=0,
            grid=(num_tiles,),
            in_specs=[
                pl.BlockSpec((tm, dp), lambda i: (i, 0)),
                # Grid-invariant: constant block index -> DMA'd once, resident.
                pl.BlockSpec((L, dp, dp), lambda i: (0, 0, 0)),
                pl.BlockSpec((L, 1, dp), lambda i: (0, 0, 0)),
            ],
            out_specs=pl.BlockSpec((tm, dp), lambda i: (i, 0)),
        ),
        compiler_params=pltpu.CompilerParams(
            # Independent batch tiles -> shard across both TCs on v7x.
            dimension_semantics=("parallel",),
            vmem_limit_bytes=vmem_limit,
        ),
        cost_estimate=pl.CostEstimate(
            flops=flops, transcendentals=0, bytes_accessed=bytes_accessed),
        # Reuse x's HBM buffer for the output when the caller donates it.
        input_output_aliases=({0: 0} if donate_x else {}),
    )(xp, w_t, b_r)

    if bp != B or dp != D:
        out = out[:B, :D]
    return out


# --------------------------------------------------------------------------
# Pure-JAX references
# --------------------------------------------------------------------------
def cross_network_ref(x, weights, biases, matmul_dtype=None):
    """matmul_dtype=None -> accurate f32 math; otherwise mirrors the kernel's
    recipe (matmul inputs cast to matmul_dtype, f32 accumulate, f32 carry)."""
    x0 = x.astype(jnp.float32)
    xx = x0
    for i in range(weights.shape[0]):
        w = weights[i].T
        if matmul_dtype is None:
            xw = jnp.dot(xx, w, precision="highest",
                         preferred_element_type=jnp.float32)
        else:
            xw = jnp.dot(xx.astype(matmul_dtype), w.astype(matmul_dtype),
                         preferred_element_type=jnp.float32)
        xx = x0 * xw + biases[i][None, :].astype(jnp.float32) + xx
    return xx.astype(x.dtype)


def _assert_close(out, ref, tol, name):
    out = jnp.asarray(out, jnp.float32)
    ref = jnp.asarray(ref, jnp.float32)
    scale = float(jnp.maximum(jnp.max(jnp.abs(ref)), 1.0))
    err = float(jnp.max(jnp.abs(out - ref)))
    assert err <= tol * scale, (
        f"{name}: max_abs_err={err:.3e} scale={scale:.3e} tol={tol}")


# --------------------------------------------------------------------------
# Demo / self-test
# --------------------------------------------------------------------------
if __name__ == "__main__":
    key = jax.random.PRNGKey(0)

    def init_params(k, d, num_layers):
        # Xavier-normal-style weights; small nonzero biases to exercise the add.
        kw, kb = jax.random.split(k)
        std = (2.0 / (d + d)) ** 0.5
        w = std * jax.random.normal(kw, (num_layers, d, d), dtype=jnp.float32)
        b = 0.02 * jax.random.normal(kb, (num_layers, d), dtype=jnp.float32)
        return w, b

    def run_case(kx, kp, B, D, L):
        x = jax.random.normal(kx, (B, D), dtype=jnp.float32)
        w, b = init_params(kp, D, L)

        # ---- exact f32 path --------------------------------------------
        wt32, br32 = prepare_cross_params(w, b, matmul_dtype=None)
        out32 = jax.block_until_ready(cross_network(x, wt32, br32))
        assert out32.shape == (B, D) and out32.dtype == x.dtype
        # Tolerance bounded by cross-implementation f32 matmul precision on
        # TPU (XLA default pass count vs Mosaic), not by the kernel math.
        _assert_close(out32, cross_network_ref(x, w, b), 5e-2, "f32 path")

        # ---- bf16 MXU path (perf default) --------------------------------
        wt16, br16 = prepare_cross_params(w, b, matmul_dtype=jnp.bfloat16)
        out16 = jax.block_until_ready(cross_network(x, wt16, br16))
        assert out16.shape == (B, D)
        # Compare against the bf16-mirrored reference (the previous submission
        # compared against the pure-f32 reference and tripped on compounded
        # bf16 rounding at L=4).
        _assert_close(out16,
                      cross_network_ref(x, w, b, matmul_dtype=jnp.bfloat16),
                      2e-2, "bf16 path")

    k1, k2, k3, k4 = jax.random.split(key, 4)

    # Case 1: module-spec-like small shapes; D=32 exercises lane padding to 128.
    run_case(k1, k2, B=8, D=32, L=3)

    # Case 2: lane-dense D, B>256 -> two batch tiles on the "parallel" axis
    # (shards across both v7x TCs) and a zero-padded partial last tile.
    run_case(k3, k4, B=500, D=128, L=4)

    print("KERNEL_OK")
</pallas_src>

<mosaic_0001>
module attributes {stable_mosaic.version = 11 : i64} {
  func.func @cross_kernel(%arg0: i32, %arg1: memref<8x128xf32, #tpu.memory_space<vmem>>, %arg2: memref<3x128x128xf32, #tpu.memory_space<vmem>>, %arg3: memref<3x1x128xf32, #tpu.memory_space<vmem>>, %arg4: memref<8x128xf32, #tpu.memory_space<vmem>>) attributes {dimension_semantics = [#tpu.dimension_semantics<parallel>], iteration_bounds = array<i64: 1>, scalar_prefetch = 0 : i64, scratch_operands = 0 : i64, tpu.core_type = #tpu.core_type<tc>, window_params = [{transform_indices = @transform_0, window_bounds = array<i64: 8, 128>}, {pipeline_mode = #tpu.pipeline_mode<synchronous>, transform_indices = @transform_1, window_bounds = array<i64: 3, 128, 128>}, {pipeline_mode = #tpu.pipeline_mode<synchronous>, transform_indices = @transform_2, window_bounds = array<i64: 3, 1, 128>}, {transform_indices = @transform_3, window_bounds = array<i64: 8, 128>}]} {
    %c0 = arith.constant 0 : index
    %c0_0 = arith.constant 0 : index
    %0 = vector.load %arg1[%c0, %c0_0] : memref<8x128xf32, #tpu.memory_space<vmem>>, vector<8x128xf32>
    %c0_1 = arith.constant 0 : index
    %c0_2 = arith.constant 0 : index
    %c0_3 = arith.constant 0 : index
    %1 = vector.load %arg2[%c0_1, %c0_2, %c0_3] : memref<3x128x128xf32, #tpu.memory_space<vmem>>, vector<1x128x128xf32>
    %2 = vector.shape_cast %1 : vector<1x128x128xf32> to vector<128x128xf32>
    %cst = arith.constant dense<0.000000e+00> : vector<8x128xf32>
    %3 = tpu.matmul %0, %2, %cst {dimension_numbers = #tpu.dot_dimension_numbers<[1], [0], [0], [1], [0, 0, 1, 1], [], []>} : vector<8x128xf32>, vector<128x128xf32>, vector<8x128xf32> -> vector<8x128xf32>
    %4 = arith.mulf %0, %3 : vector<8x128xf32>
    %c0_4 = arith.constant 0 : index
    %c0_5 = arith.constant 0 : index
    %c0_6 = arith.constant 0 : index
    %5 = vector.load %arg3[%c0_4, %c0_5, %c0_6] : memref<3x1x128xf32, #tpu.memory_space<vmem>>, vector<1x1x128xf32>
    %6 = vector.shape_cast %5 : vector<1x1x128xf32> to vector<1x128xf32>
    %7 = vector.broadcast %6 : vector<1x128xf32> to vector<8x128xf32>
    %8 = arith.addf %4, %7 : vector<8x128xf32>
    %9 = arith.addf %8, %0 : vector<8x128xf32>
    %c1 = arith.constant 1 : index
    %c0_7 = arith.constant 0 : index
    %c0_8 = arith.constant 0 : index
    %10 = vector.load %arg2[%c1, %c0_7, %c0_8] : memref<3x128x128xf32, #tpu.memory_space<vmem>>, vector<1x128x128xf32>
    %11 = vector.shape_cast %10 : vector<1x128x128xf32> to vector<128x128xf32>
    %cst_9 = arith.constant dense<0.000000e+00> : vector<8x128xf32>
    %12 = tpu.matmul %9, %11, %cst_9 {dimension_numbers = #tpu.dot_dimension_numbers<[1], [0], [0], [1], [0, 0, 1, 1], [], []>} : vector<8x128xf32>, vector<128x128xf32>, vector<8x128xf32> -> vector<8x128xf32>
    %13 = arith.mulf %0, %12 : vector<8x128xf32>
    %c1_10 = arith.constant 1 : index
    %c0_11 = arith.constant 0 : index
    %c0_12 = arith.constant 0 : index
    %14 = vector.load %arg3[%c1_10, %c0_11, %c0_12] : memref<3x1x128xf32, #tpu.memory_space<vmem>>, vector<1x1x128xf32>
    %15 = vector.shape_cast %14 : vector<1x1x128xf32> to vector<1x128xf32>
    %16 = vector.broadcast %15 : vector<1x128xf32> to vector<8x128xf32>
    %17 = arith.addf %13, %16 : vector<8x128xf32>
    %18 = arith.addf %17, %9 : vector<8x128xf32>
    %c2 = arith.constant 2 : index
    %c0_13 = arith.constant 0 : index
    %c0_14 = arith.constant 0 : index
    %19 = vector.load %arg2[%c2, %c0_13, %c0_14] : memref<3x128x128xf32, #tpu.memory_space<vmem>>, vector<1x128x128xf32>
    %20 = vector.shape_cast %19 : vector<1x128x128xf32> to vector<128x128xf32>
    %cst_15 = arith.constant dense<0.000000e+00> : vector<8x128xf32>
    %21 = tpu.matmul %18, %20, %cst_15 {dimension_numbers = #tpu.dot_dimension_numbers<[1], [0], [0], [1], [0, 0, 1, 1], [], []>} : vector<8x128xf32>, vector<128x128xf32>, vector<8x128xf32> -> vector<8x128xf32>
    %22 = arith.mulf %0, %21 : vector<8x128xf32>
    %c2_16 = arith.constant 2 : index
    %c0_17 = arith.constant 0 : index
    %c0_18 = arith.constant 0 : index
    %23 = vector.load %arg3[%c2_16, %c0_17, %c0_18] : memref<3x1x128xf32, #tpu.memory_space<vmem>>, vector<1x1x128xf32>
    %24 = vector.shape_cast %23 : vector<1x1x128xf32> to vector<1x128xf32>
    %25 = vector.broadcast %24 : vector<1x128xf32> to vector<8x128xf32>
    %26 = arith.addf %22, %25 : vector<8x128xf32>
    %27 = arith.addf %26, %18 : vector<8x128xf32>
    %c0_19 = arith.constant 0 : index
    %c0_20 = arith.constant 0 : index
    %28 = vector.load %arg4[%c0_19, %c0_20] : memref<8x128xf32, #tpu.memory_space<vmem>>, vector<8x128xf32>
    tpu.vector_store %arg4[%c0_19, %c0_20], %27 {strides = array<i32>} : memref<8x128xf32, #tpu.memory_space<vmem>>, vector<8x128xf32>,
    return
  }
  func.func @transform_0(%arg0: i32) -> (i32, i32) {
    %c0_i32 = arith.constant 0 : i32
    %c0_i32_0 = arith.constant 0 : i32
    return %arg0, %c0_i32 : i32, i32
  }
  func.func @transform_1(%arg0: i32) -> (i32, i32, i32) {
    %c0_i32 = arith.constant 0 : i32
    %c0_i32_0 = arith.constant 0 : i32
    %c0_i32_1 = arith.constant 0 : i32
    %c0_i32_2 = arith.constant 0 : i32
    return %c0_i32, %c0_i32_0, %c0_i32_1 : i32, i32, i32
  }
  func.func @transform_2(%arg0: i32) -> (i32, i32, i32) {
    %c0_i32 = arith.constant 0 : i32
    %c0_i32_0 = arith.constant 0 : i32
    %c0_i32_1 = arith.constant 0 : i32
    %c0_i32_2 = arith.constant 0 : i32
    return %c0_i32, %c0_i32_0, %c0_i32_1 : i32, i32, i32
  }
  func.func @transform_3(%arg0: i32) -> (i32, i32) {
    %c0_i32 = arith.constant 0 : i32
    %c0_i32_0 = arith.constant 0 : i32
    return %arg0, %c0_i32 : i32, i32
  }
}

</mosaic_0001>

<bundles_post_ra>
// kernel: tpu_custom_call.1
= control target key start
LH: loop header
LB: loop body
LE: loop exit
PB: predicated region body
PF: predicated region fallthrough
CT: control target
= control target key end

     0   :  { %8 = vsyncpa [#allocation3], 0  ;;  %s691_s0 = inlined_call_operand.hbm [shape: f32[8,128], index: 0, kind: input, shape index: {}]   ;;  %s692_s1 = inlined_call_operand.hbm [shape: f32[3,128,128], index: 1, kind: input, shape index: {}]   ;;  %s693_s2 = inlined_call_operand.vmem [shape: f32[3,1,128], index: 2, kind: input, shape index: {}]   ;;  %s694_s3 = inlined_call_operand.hbm [shape: f32[8,128], index: 3, kind: output, shape index: {}]  }
   0x1   :  { %9 = vsyncpa [#allocation6], 0 }
   0x2   :  { %10 = vsyncpa [#allocation4], 0  ;;  %s585_s12 = smov [#allocation2]   ;;  %s586_s14 = smov [#allocation5]  }
   0x3   :  { %s17_s13 = sshll.u32 %s585_s12, 4  ;;  %s26_s15 = sshll.u32 %s586_s14, 4  ;;  %s18_s13 = int_to_ptr.vmem [resolvable:$true] %s17_s13  ;;  %s27_s15 = int_to_ptr.vmem [resolvable:$true] %s26_s15 }
   0x4   :  { %s527_s16 = scalar_lea.vmem %s18_s13, 128  ;;  %p532_p1 = scmp.lt.s32.totalorder %s18_s13, %s18_s13 }
   0x5   :  { %p528_p0 = scmp.ne.s32.totalorder %s18_s13, %s527_s16  ;;  %p533_p2 = scmp.lt.s32.totalorder %s527_s16, %s527_s16 }
   0x7   :  { %p534_p3 = por %p533_p2, %p532_p1 }
   0x9   :  { %p535_p4 = pnand %p534_p3, %p528_p0 }
   0xb   :  { %538 = shalt.err (!%p535_p4)
}
   0xc   :  { %20 = dma.hbm_to_vmem [thread:$0]  %s691_s0, 128, %s18_s13, [#allocation3]  }
   0xd   :  { %s547_s19 = scalar_lea.vmem %s27_s15, 6144  ;;  %p552_p6 = scmp.lt.s32.totalorder %s27_s15, %s27_s15 }
   0xe   :  { %p548_p5 = scmp.ne.s32.totalorder %s27_s15, %s547_s19  ;;  %p553_p7 = scmp.lt.s32.totalorder %s547_s19, %s547_s19 }
  0x10   :  { %p554_p8 = por %p553_p7, %p552_p6 }
  0x12   :  { %p555_p9 = pnand %p554_p8, %p548_p5 }
  0x14   :  { %558 = shalt.err (!%p555_p9)
}
  0x15   :  { %s587_s20 = smov 128   ;;  %s588_s21 = smov 8  }
  0x16   :  { %32 = dma.hbm_to_vmem [thread:$0]  %s692_s1, 6144, %s27_s15, [#allocation6], %s587_s20, %s587_s20, %s588_s21  }
  0x17   :  { %579 = dma.done.wait [#allocation3], 128  }
  0x18   :  { %580 = vsyncadd [#allocation3], 4294967168 }
  0x19   :  { %581 = dma.done.wait [#allocation6], 6144  }
  0x1a   :  { %582 = vsyncadd [#allocation6], 4294961152  ;;  %v589_v0 = vmov 0.0   ;;  %vm590_vm0 = vmmov 0   ;;  %v57_v1 = vld [vmem:[#allocation5 + $0x78] sm:$0xff]  ;;  %v56_v2 = vld [vmem:[#allocation5 + $0x70] sm:$0xff] }
  0x1b   :  { %407 = vmatprep.subr.mxu0 %v589_v0  ;;  %439 = vmatprep.mubr.msk.f32.mxu0 %vm590_vm0, %v589_v0  ;;  %v55_v3 = vld [vmem:[#allocation5 + $0x68] sm:$0xff]  ;;  %v54_v4 = vld [vmem:[#allocation5 + $0x60] sm:$0xff]  ;;  %v154_v5 = vld [vmem:[#allocation5 + $0xf8] sm:$0xff]  ;;  %s591_s28 = smov [#allocation7]  }
  0x1c   :  { %442 = vmatprep.subr.mxu1 %v589_v0  ;;  %474 = vmatprep.mubr.msk.f32.mxu1 %vm590_vm0, %v589_v0  ;;  %v53_v6 = vld [vmem:[#allocation5 + $0x58] sm:$0xff]  ;;  %v153_v7 = vld [vmem:[#allocation5 + $0xf0] sm:$0xff]  ;;  %v152_v8 = vld [vmem:[#allocation5 + $0xe8] sm:$0xff]  ;;  %s341_s29 = sshll.u32 %s591_s28, 4  ;;  %s342_s29 = int_to_ptr.vmem [resolvable:$true] %s341_s29 }
  0x1d   :  { %408 = vmatpush3.msra.mxu0 %v57_v1  ;;  %443 = vmatpush3.msra.mxu1 %v154_v5  ;;  %v52_v9 = vld [vmem:[#allocation5 + $0x50] sm:$0xff]  ;;  %v151_v10 = vld [vmem:[#allocation5 + $0xe0] sm:$0xff]  ;;  %v51_v11 = vld [vmem:[#allocation5 + $0x48] sm:$0xff]  ;;  %s559_s30 = scalar_lea.vmem %s342_s29, 128  ;;  %p564_p11 = scmp.lt.s32.totalorder %s342_s29, %s342_s29 }
  0x1e   :  { %409 = vmatprep.subr.mxu0 %v589_v0  ;;  %444 = vmatprep.subr.mxu1 %v589_v0  ;;  %v150_v12 = vld [vmem:[#allocation5 + $0xd8] sm:$0xff]  ;;  %v50_v13 = vld [vmem:[#allocation5 + $0x40] sm:$0xff]  ;;  %v149_v14 = vld [vmem:[#allocation5 + $0xd0] sm:$0xff]  ;;  %p560_p10 = scmp.ne.s32.totalorder %s342_s29, %s559_s30  ;;  %p565_p12 = scmp.lt.s32.totalorder %s559_s30, %s559_s30 }
  0x1f   :  { %410 = vmatpush3.msra.mxu0 %v56_v2  ;;  %445 = vmatpush3.msra.mxu1 %v153_v7  ;;  %v49_v15 = vld [vmem:[#allocation5 + $0x38] sm:$0xff]  ;;  %v148_v16 = vld [vmem:[#allocation5 + $0xc8] sm:$0xff]  ;;  %v48_v17 = vld [vmem:[#allocation5 + $0x30] sm:$0xff] }
  0x20   :  { %411 = vmatprep.subr.mxu0 %v589_v0  ;;  %446 = vmatprep.subr.mxu1 %v589_v0  ;;  %v147_v18 = vld [vmem:[#allocation5 + $0xc0] sm:$0xff]  ;;  %v47_v19 = vld [vmem:[#allocation5 + $0x28] sm:$0xff]  ;;  %v146_v20 = vld [vmem:[#allocation5 + $0xb8] sm:$0xff]  ;;  %p566_p13 = por %p565_p12, %p564_p11 }
  0x21   :  { %412 = vmatpush3.msra.mxu0 %v55_v3  ;;  %447 = vmatpush3.msra.mxu1 %v152_v8  ;;  %v46_v21 = vld [vmem:[#allocation5 + $0x20] sm:$0xff]  ;;  %v145_v22 = vld [vmem:[#allocation5 + $0xb0] sm:$0xff]  ;;  %v45_v23 = vld [vmem:[#allocation5 + $0x18] sm:$0xff] }
  0x22   :  { %413 = vmatprep.subr.mxu0 %v589_v0  ;;  %448 = vmatprep.subr.mxu1 %v589_v0  ;;  %v144_v24 = vld [vmem:[#allocation5 + $0xa8] sm:$0xff]  ;;  %v44_v25 = vld [vmem:[#allocation5 + $0x10] sm:$0xff]  ;;  %v143_v26 = vld [vmem:[#allocation5 + $0xa0] sm:$0xff]  ;;  %p567_p0 = pnand %p566_p13, %p560_p10 }
  0x23   :  { %414 = vmatpush3.msra.mxu0 %v54_v4  ;;  %449 = vmatpush3.msra.mxu1 %v151_v10  ;;  %v43_v27 = vld [vmem:[#allocation5 + $0x8] sm:$0xff]  ;;  %v42_v28 = vld [vmem:[#allocation5] sm:$0xff]  ;;  %v649_v29 = vld [vmem:[#allocation2] sm:$0xff] }
  0x24   :  { %415 = vmatprep.subr.mxu0 %v589_v0  ;;  %450 = vmatprep.subr.mxu1 %v589_v0  ;;  %v142_v30 = vld [vmem:[#allocation5 + $0x98] sm:$0xff]  ;;  %v141_v31 = vld [vmem:[#allocation5 + $0x90] sm:$0xff]  ;;  %v140_v32 = vld [vmem:[#allocation5 + $0x88] sm:$0xff] }
  0x25   :  { %416 = vmatpush3.msra.mxu0 %v53_v6  ;;  %451 = vmatpush3.msra.mxu1 %v150_v12  ;;  %v139_v33 = vld [vmem:[#allocation5 + $0x80] sm:$0xff]  ;;  %v252_v34 = vld [vmem:[#allocation5 + $0x178] sm:$0xff]  ;;  %v251_v35 = vld [vmem:[#allocation5 + $0x170] sm:$0xff] }
  0x26   :  { %417 = vmatprep.subr.mxu0 %v589_v0  ;;  %452 = vmatprep.subr.mxu1 %v589_v0  ;;  %v250_v36 = vld [vmem:[#allocation5 + $0x168] sm:$0xff]  ;;  %v249_v37 = vld [vmem:[#allocation5 + $0x160] sm:$0xff]  ;;  %v248_v38 = vld [vmem:[#allocation5 + $0x158] sm:$0xff] }
  0x27   :  { %418 = vmatpush3.msra.mxu0 %v52_v9  ;;  %453 = vmatpush3.msra.mxu1 %v149_v14  ;;  %v247_v39 = vld [vmem:[#allocation5 + $0x150] sm:$0xff]  ;;  %v246_v40 = vld [vmem:[#allocation5 + $0x148] sm:$0xff]  ;;  %v245_v41 = vld [vmem:[#allocation5 + $0x140] sm:$0xff] }
  0x28   :  { %419 = vmatprep.subr.mxu0 %v589_v0  ;;  %454 = vmatprep.subr.mxu1 %v589_v0  ;;  %v244_v42 = vld [vmem:[#allocation5 + $0x138] sm:$0xff]  ;;  %v243_v43 = vld [vmem:[#allocation5 + $0x130] sm:$0xff]  ;;  %v242_v44 = vld [vmem:[#allocation5 + $0x128] sm:$0xff] }
  0x29   :  { %420 = vmatpush3.msra.mxu0 %v51_v11  ;;  %455 = vmatpush3.msra.mxu1 %v148_v16  ;;  %v241_v45 = vld [vmem:[#allocation5 + $0x120] sm:$0xff]  ;;  %v351_v47 = vld [vmem:[%s693_s2] ss:$0 sm:$0xff]  ;;  %v239_v53 = vld [vmem:[#allocation5 + $0x110] sm:$0xff] }
  0x2a   :  { %421 = vmatprep.subr.mxu0 %v589_v0  ;;  %456 = vmatprep.subr.mxu1 %v589_v0  ;;  %v240_v52 = vld [vmem:[#allocation5 + $0x118] sm:$0xff]  ;;  %v238_v54 = vld [vmem:[#allocation5 + $0x108] sm:$0xff]  ;;  %v237_v55 = vld [vmem:[#allocation5 + $0x100] sm:$0xff] }
  0x2b   :  { %422 = vmatpush3.msra.mxu0 %v50_v13  ;;  %457 = vmatpush3.msra.mxu1 %v147_v18  ;;  %v353_v57 = vld [vmem:[%s693_s2 + $0x1] ss:$0 sm:$0xff]  ;;  %v355_v63 = vld [vmem:[%s693_s2 + $0x2] ss:$0 sm:$0xff] }
  0x2c   :  { %423 = vmatprep.subr.mxu0 %v589_v0  ;;  %458 = vmatprep.subr.mxu1 %v589_v0 }
  0x2d   :  { %424 = vmatpush3.msra.mxu0 %v49_v15  ;;  %459 = vmatpush3.msra.mxu1 %v146_v20 }
  0x2e   :  { %425 = vmatprep.subr.mxu0 %v589_v0  ;;  %460 = vmatprep.subr.mxu1 %v589_v0 }
  0x2f   :  { %426 = vmatpush3.msra.mxu0 %v48_v17  ;;  %461 = vmatpush3.msra.mxu1 %v145_v22 }
  0x30   :  { %427 = vmatprep.subr.mxu0 %v589_v0  ;;  %462 = vmatprep.subr.mxu1 %v589_v0 }
  0x31   :  { %428 = vmatpush3.msra.mxu0 %v47_v19  ;;  %463 = vmatpush3.msra.mxu1 %v144_v24 }
  0x32   :  { %429 = vmatprep.subr.mxu0 %v589_v0  ;;  %464 = vmatprep.subr.mxu1 %v589_v0 }
  0x33   :  { %430 = vmatpush3.msra.mxu0 %v46_v21  ;;  %465 = vmatpush3.msra.mxu1 %v143_v26 }
  0x34   :  { %431 = vmatprep.subr.mxu0 %v589_v0  ;;  %466 = vmatprep.subr.mxu1 %v589_v0 }
  0x35   :  { %432 = vmatpush3.msra.mxu0 %v45_v23  ;;  %467 = vmatpush3.msra.mxu1 %v142_v30 }
  0x36   :  { %433 = vmatprep.subr.mxu0 %v589_v0  ;;  %468 = vmatprep.subr.mxu1 %v589_v0 }
  0x37   :  { %434 = vmatpush3.msra.mxu0 %v44_v25  ;;  %469 = vmatpush3.msra.mxu1 %v141_v31 }
  0x38   :  { %435 = vmatprep.subr.mxu0 %v589_v0  ;;  %470 = vmatprep.subr.mxu1 %v589_v0 }
  0x39   :  { %436 = vmatpush3.msra.mxu0 %v43_v27  ;;  %471 = vmatpush3.msra.mxu1 %v140_v32 }
  0x3a   :  { %437 = vmatprep.subr.mxu0 %v589_v0  ;;  %472 = vmatprep.subr.mxu1 %v589_v0 }
  0x3b   :  { %438 = vmatpush3.msra.mxu0 %v42_v28  ;;  %473 = vmatpush3.msra.mxu1 %v139_v33 }
  0x3c   :  { %440 = vmatmul.mubr.f32.vlgmr.msra.gmra.mxu0 %v649_v29  ;;  %477 = vmatprep.subr.mxu0 %v589_v0 }
  0x3d   :  { %509 = vmatprep.mubr.msk.f32.mxu0 %vm590_vm0, %v589_v0  ;;  %478 = vmatpush3.msra.mxu0 %v252_v34 }
  0x3e   :  { %479 = vmatprep.subr.mxu0 %v589_v0 }
  0x3f   :  { %480 = vmatpush3.msra.mxu0 %v251_v35 }
  0x40   :  { %481 = vmatprep.subr.mxu0 %v589_v0 }
  0x41   :  { %482 = vmatpush3.msra.mxu0 %v250_v36 }
  0x42   :  { %483 = vmatprep.subr.mxu0 %v589_v0 }
  0x43   :  { %484 = vmatpush3.msra.mxu0 %v249_v37 }
  0x44   :  { %485 = vmatprep.subr.mxu0 %v589_v0 }
  0x45   :  { %486 = vmatpush3.msra.mxu0 %v248_v38 }
  0x46   :  { %487 = vmatprep.subr.mxu0 %v589_v0 }
  0x47   :  { %488 = vmatpush3.msra.mxu0 %v247_v39 }
  0x48   :  { %489 = vmatprep.subr.mxu0 %v589_v0 }
  0x49   :  { %490 = vmatpush3.msra.mxu0 %v246_v40 }
  0x4a   :  { %491 = vmatprep.subr.mxu0 %v589_v0 }
  0x4b   :  { %492 = vmatpush3.msra.mxu0 %v245_v41 }
  0x4c   :  { %493 = vmatprep.subr.mxu0 %v589_v0 }
  0x4d   :  { %494 = vmatpush3.msra.mxu0 %v244_v42 }
  0x4e   :  { %495 = vmatprep.subr.mxu0 %v589_v0 }
  0x4f   :  { %496 = vmatpush3.msra.mxu0 %v243_v43 }
  0x50   :  { %497 = vmatprep.subr.mxu0 %v589_v0 }
  0x51   :  { %498 = vmatpush3.msra.mxu0 %v242_v44 }
  0x52   :  { %499 = vmatprep.subr.mxu0 %v589_v0 }
  0x53   :  { %500 = vmatpush3.msra.mxu0 %v241_v45 }
  0x54   :  { %501 = vmatprep.subr.mxu0 %v589_v0 }
  0x55   :  { %502 = vmatpush3.msra.mxu0 %v240_v52 }
  0x56   :  { %503 = vmatprep.subr.mxu0 %v589_v0 }
  0x57   :  { %504 = vmatpush3.msra.mxu0 %v239_v53 }
  0x58   :  { %505 = vmatprep.subr.mxu0 %v589_v0 }
  0x59   :  { %506 = vmatpush3.msra.mxu0 %v238_v54 }
  0x5a   :  { %507 = vmatprep.subr.mxu0 %v589_v0 }
  0x5b   :  { %508 = vmatpush3.msra.mxu0 %v237_v55 }
  0xfc   :  { %v124_v46 = vpop.f32.mrf.mxu0 }
  0xfd   :  { %v128_v48 = vmul.f32 %v124_v46, %v649_v29 }
  0xfe   :  { %v441_v49 = vpop.f32.mrf.mxu0 }
  0xff   :  { %v136_v50 = vadd.f32 %v351_v47, %v128_v48 }
 0x101   :  { %v137_v51 = vadd.f32 %v136_v50, %v649_v29 }
 0x103   :  { %475 = vmatmul.mubr.f32.vlgmr.msra.gmra.mxu1 %v137_v51 }
 0x1c3   :  { %v221_v56 = vpop.f32.mrf.mxu1 }
 0x1c4   :  { %v225_v58 = vmul.f32 %v221_v56, %v649_v29 }
 0x1c5   :  { %v476_v59 = vpop.f32.mrf.mxu1 }
 0x1c6   :  { %v234_v60 = vadd.f32 %v353_v57, %v225_v58 }
 0x1c8   :  { %v235_v61 = vadd.f32 %v234_v60, %v137_v51 }
 0x1ca   :  { %510 = vmatmul.mubr.f32.vlgmr.msra.gmra.mxu0 %v235_v61 }
 0x28a   :  { %v319_v62 = vpop.f32.mrf.mxu0 }
 0x28b   :  { %v323_v0 = vmul.f32 %v319_v62, %v649_v29 }
 0x28c   :  { %v511_v1 = vpop.f32.mrf.mxu0 }
 0x28d   :  { %v332_v2 = vadd.f32 %v355_v63, %v323_v0 }
 0x28f   :  { %v333_v3 = vadd.f32 %v332_v2, %v235_v61 }
 0x291   :  { %334 = vst [vmem:[#allocation7] sm:$0xff] %v333_v3 }
 0x292   :  { %570 = shalt.err (!%p567_p0)
}
 0x293   :  { %344 = dma.vmem_to_hbm [thread:$0]  %s342_s29, 128, %s694_s3, [#allocation4]  }
 0x294   :  { %583 = dma.done.wait [#allocation4], 128  }
 0x295   :  { %584 = vsyncadd [#allocation4], 4294967168 }
 0x296   :  { %348 = vsyncpa [#allocation3], 1 }
 0x297   :  { %349 = vsyncpa [#allocation6], 1 }
 0x298   :  { %350 = vsyncpa [#allocation4], 1 }

</bundles_post_ra>
